<compile_context>
chip_gen: v5e
topology: v5e:2x2
jax: 0.10.0
libtpu: 0.0.40
codegen_flags: <defaults>
</compile_context>

<pallas_src>
import math

import jax
import jax.numpy as jnp
from jax.experimental import pallas as pl
from jax.experimental.pallas import tpu as pltpu

_MIB = 1024 * 1024


def _round_up(x, m):
    return (x + m - 1) // m * m


def _round_down(x, m):
    return max(m, (x // m) * m)


def _cdiv(a, b):
    return -(-a // b)


def _vmem_capacity_bytes():
    try:
        cap = int(pltpu.get_tpu_info().vmem_capacity_bytes)
        if cap > 0:
            return cap
    except Exception:
        pass
    return 64 * _MIB  # conservative (v7x) fallback


def _row_tile(rows, per_row_bytes, stream_budget, max_tm=4096):
    """Largest row tile (multiple of 8) whose pipelined footprint fits."""
    if rows <= 8:
        return rows
    tm = stream_budget // max(per_row_bytes, 1)
    tm = _round_down(min(tm, max_tm), 8)
    tm = max(8, tm)
    if tm >= rows:
        return rows  # full-extent block is always legal
    return int(tm)


def _maybe_split_rows(rows, tm, min_steps=4):
    """Ensure enough row-grid steps so both v7x TensorCores get fed."""
    if tm >= rows:
        return tm
    n = _cdiv(rows, tm)
    if 1 < n < min_steps and rows >= min_steps * 8:
        tm = max(8, _round_up(_cdiv(rows, min_steps), 8))
    return tm


def _vmem_limit(need, cap):
    limit = int(min(max(need * 5 // 4, 16 * _MIB), int(cap * 0.9)))
    return max(limit, int(need))  # never clamp below the real footprint


# ---------------------------------------------------------------------------
# Factorized kernel (fp32 activations, residents fit):
#   t = x @ V^T ; y = t @ U^T (+ bias)
# Vt = V^T (in, rank), Ut = U^T (rank, out) are pre-transposed in the wrapper,
# so both dots contract (1,)x(0,) and nothing touches the XLU per iteration.
# ---------------------------------------------------------------------------
def _make_factored_kernel(has_bias):
    def kernel(x_ref, vt_ref, ut_ref, *rest):
        if has_bias:
            b_ref, o_ref = rest
        else:
            (o_ref,) = rest
        t = jnp.dot(x_ref[...], vt_ref[...], preferred_element_type=jnp.float32)
        y = jnp.dot(t, ut_ref[...], preferred_element_type=jnp.float32)
        y = y.astype(o_ref.dtype)
        if has_bias:
            y = y + b_ref[...].astype(o_ref.dtype)
        o_ref[...] = y
    return kernel


def _factored_forward(x2d, Vt, Ut, bias, out_dtype, budget, cap):
    rows, in_f = x2d.shape
    rank, out_f = Ut.shape
    has_bias = bias is not None

    xb = x2d.dtype.itemsize
    ob = jnp.dtype(out_dtype).itemsize

    resident = 4 * (in_f * rank + rank * out_f) + (2 * 4 * out_f if has_bias else 0)
    stream_budget = max(budget - resident, 2 * _MIB)
    # Per-row: double-buffered x in, double-buffered y out, fp32 temporaries.
    per_row = 2 * in_f * xb + 2 * out_f * ob + 4 * (rank + out_f)
    tm = _row_tile(rows, per_row, stream_budget)
    tm = _maybe_split_rows(rows, tm)
    n_tiles = _cdiv(rows, tm)

    need = (2 * tm * in_f * xb + 2 * tm * out_f * ob
            + tm * (rank + out_f) * 4 + resident)
    limit = _vmem_limit(need, cap)

    in_specs = [
        pl.BlockSpec((tm, in_f), lambda i: (i, 0)),      # streamed x
        pl.BlockSpec((in_f, rank), lambda i: (0, 0)),    # Vt resident
        pl.BlockSpec((rank, out_f), lambda i: (0, 0)),   # Ut resident
    ]
    args = [x2d, Vt, Ut]
    if has_bias:
        in_specs.append(pl.BlockSpec((1, out_f), lambda i: (0, 0)))  # bias resident
        args.append(bias.astype(jnp.float32).reshape(1, out_f))

    cost = pl.CostEstimate(
        flops=2 * rows * rank * (in_f + out_f),
        transcendentals=0,
        bytes_accessed=rows * in_f * xb + rows * out_f * ob + resident,
    )

    return pl.pallas_call(
        _make_factored_kernel(has_bias),
        out_shape=jax.ShapeDtypeStruct((rows, out_f), out_dtype),
        grid=(n_tiles,),
        in_specs=in_specs,
        out_specs=pl.BlockSpec((tm, out_f), lambda i: (i, 0)),
        compiler_params=pltpu.CompilerParams(
            dimension_semantics=("parallel",),   # shard row tiles across TCs
            vmem_limit_bytes=limit,
        ),
        cost_estimate=cost,
    )(*args)


# ---------------------------------------------------------------------------
# On-the-fly W^T reconstruction kernel (exact PyTorch rounding, no W in HBM):
#   grid = (out_tiles OUTER, row_tiles INNER)
#   at row_tile == 0:  wt_scratch = (V^T @ U^T[:, j]).astype(x.dtype)
#   every step:        y = x @ wt_scratch (+ bias)
# ---------------------------------------------------------------------------
def _make_reconstruct_kernel(has_bias):
    def kernel(x_ref, vt_ref, ut_ref, *rest):
        if has_bias:
            b_ref, o_ref, wt_ref = rest
        else:
            o_ref, wt_ref = rest

        @pl.when(pl.program_id(1) == 0)
        def _():
            wt = jnp.dot(vt_ref[...], ut_ref[...],
                         preferred_element_type=jnp.float32)      # (in_f, tn) fp32
            wt_ref[...] = wt.astype(wt_ref.dtype)                 # torch: (U@V).to(x.dtype)

        y = jnp.dot(x_ref[...], wt_ref[...],
                    preferred_element_type=jnp.float32)           # (tm, tn)
        y = y.astype(o_ref.dtype)
        if has_bias:
            y = y + b_ref[...].astype(o_ref.dtype)
        o_ref[...] = y
    return kernel


def _choose_out_tile(out_f, in_f, rank, x_bytes, budget):
    if out_f % 128 != 0:
        # Full-extent last dim is legal; avoids pad + wrapper slice.
        return out_f
    for cand in (2048, 1024, 512, 256, 128):
        if cand > out_f:
            continue
        fixed = (in_f * cand * x_bytes          # W^T tile scratch
                 + 2 * 4 * rank * cand          # double-buffered Ut tile
                 + 2 * 4 * cand                 # bias tile
                 + 4 * in_f * rank)             # resident Vt
        if fixed <= budget // 2:
            return cand
    return 128


def _reconstruct_forward(x2d, Vt, Ut, bias, out_dtype, budget, cap):
    rows, in_f = x2d.shape
    rank, out_f = Ut.shape
    has_bias = bias is not None

    xb = x2d.dtype.itemsize
    ob = jnp.dtype(out_dtype).itemsize

    tn = _choose_out_tile(out_f, in_f, rank, xb, budget)
    n_out = _cdiv(out_f, tn)

    # TODO(synk): tile in_features (K) with an fp32 accumulator if fp32 V^T
    # (rank * in_f * 4 bytes) or the (in_f, tn) W^T scratch ever exceed VMEM.
    fixed = (4 * in_f * rank                      # resident Vt
             + in_f * tn * xb                     # W^T tile scratch
             + 2 * 4 * rank * tn                  # double-buffered Ut tile
             + (2 * 4 * tn if has_bias else 0))   # bias tile
    stream_budget = max(budget - fixed, 2 * _MIB)
    per_row = 2 * in_f * xb + 2 * tn * ob + 4 * tn
    tm = _row_tile(rows, per_row, stream_budget)
    if n_out == 1:
        tm = _maybe_split_rows(rows, tm)
    n_rows = _cdiv(rows, tm)

    need = fixed + 2 * tm * in_f * xb + 2 * tm * tn * ob + tm * tn * 4
    limit = _vmem_limit(need, cap)

    in_specs = [
        pl.BlockSpec((tm, in_f), lambda j, i: (i, 0)),    # x (re-streamed per out tile)
        pl.BlockSpec((in_f, rank), lambda j, i: (0, 0)),  # Vt resident
        pl.BlockSpec((rank, tn), lambda j, i: (0, j)),    # Ut tile per out tile
    ]
    args = [x2d, Vt, Ut]
    if has_bias:
        in_specs.append(pl.BlockSpec((1, tn), lambda j, i: (0, j)))
        args.append(bias.astype(jnp.float32).reshape(1, out_f))

    cost = pl.CostEstimate(
        flops=2 * out_f * rank * in_f + 2 * rows * in_f * out_f,
        transcendentals=0,
        bytes_accessed=(n_out * rows * in_f * xb     # x re-streamed per out tile
                        + rows * out_f * ob
                        + 4 * in_f * rank + 4 * rank * out_f),
    )

    return pl.pallas_call(
        _make_reconstruct_kernel(has_bias),
        out_shape=jax.ShapeDtypeStruct((rows, out_f), out_dtype),
        grid=(n_out, n_rows),                         # out OUTER, rows INNER
        in_specs=in_specs,
        out_specs=pl.BlockSpec((tm, tn), lambda j, i: (i, j)),
        scratch_shapes=[pltpu.VMEM((in_f, tn), x2d.dtype)],
        compiler_params=pltpu.CompilerParams(
            dimension_semantics=("parallel", "arbitrary"),
            vmem_limit_bytes=limit,
        ),
        cost_estimate=cost,
    )(*args)


def low_rank_layer_forward(x, U, V, bias=None):
    """JAX/Pallas equivalent of LowRankLayer.forward.

    x: (..., in_features); U: (out_features, rank) fp32; V: (rank, in_features)
    fp32; bias: (out_features,) or None.  Returns (..., out_features) in x.dtype.
    """
    orig_shape = x.shape
    in_f = orig_shape[-1]
    out_f, rank = U.shape
    rows = int(math.prod(orig_shape[:-1])) if len(orig_shape) > 1 else 1
    x2d = x.reshape(rows, in_f)

    # One-time HBM-side transposes so every in-kernel dot is (1,)x(0,).
    Vt = jnp.transpose(V).astype(jnp.float32)   # (in_f, rank)
    Ut = jnp.transpose(U).astype(jnp.float32)   # (rank, out_f)

    cap = _vmem_capacity_bytes()
    budget = int(cap * 0.75)
    resident = 4 * (in_f * rank + rank * out_f)

    if x.dtype == jnp.float32 and resident <= budget // 2:
        # Factorized path: mathematically x @ (U@V)^T; fp32 so no rounding-to-
        # lower-precision step exists and the associativity change stays within
        # normal fp32 tolerance.
        out2d = _factored_forward(x2d, Vt, Ut, bias, x.dtype, budget, cap)
    else:
        # Preserves PyTorch's W=(U@V).astype(x.dtype) rounding: the W^T tile is
        # built in fp32 and cast to x.dtype in-kernel before the activation
        # matmul.  No (out, in) weight is ever written to HBM.
        out2d = _reconstruct_forward(x2d, Vt, Ut, bias, x.dtype, budget, cap)

    return out2d.reshape(*orig_shape[:-1], out_f)


if __name__ == "__main__":
    key = jax.random.PRNGKey(0)
    k_x, k_u, k_v, k_b = jax.random.split(key, 4)

    batch, seq = 2, 8
    in_features, out_features, rank = 32, 64, 4

    x = jax.random.normal(k_x, (batch, seq, in_features), dtype=jnp.float32)
    U = jax.random.normal(k_u, (out_features, rank), dtype=jnp.float32) * 0.1
    V = jax.random.normal(k_v, (rank, in_features), dtype=jnp.float32) * 0.1
    bias = jax.random.normal(k_b, (out_features,), dtype=jnp.float32) * 0.01

    w_ref = U @ V                                     # fp32 reference weight

    # fp32, with bias (factorized path).
    y = jax.block_until_ready(low_rank_layer_forward(x, U, V, bias))
    y_ref = x @ w_ref.T + bias
    assert y.shape == (batch, seq, out_features)
    assert jnp.allclose(y, y_ref, atol=1e-5, rtol=1e-5)

    # fp32, bias=None (bias-free kernel variant).
    y_nb = jax.block_until_ready(low_rank_layer_forward(x, U, V, None))
    assert jnp.allclose(y_nb, x @ w_ref.T, atol=1e-5, rtol=1e-5)

    # bf16 activations (on-the-fly W^T reconstruction path, torch rounding).
    x_bf = x.astype(jnp.bfloat16)
    bias_bf = bias.astype(jnp.bfloat16)
    w_bf = w_ref.astype(jnp.bfloat16)
    y_bf = jax.block_until_ready(low_rank_layer_forward(x_bf, U, V, bias_bf))
    y_bf_ref = x_bf @ w_bf.T + bias_bf
    assert y_bf.dtype == jnp.bfloat16
    assert jnp.allclose(y_bf.astype(jnp.float32), y_bf_ref.astype(jnp.float32),
                        atol=1e-2, rtol=5e-2)

    # bf16, bias=None (bias-free reconstruction variant).
    y_bf_nb = jax.block_until_ready(low_rank_layer_forward(x_bf, U, V, None))
    assert jnp.allclose(y_bf_nb.astype(jnp.float32),
                        (x_bf @ w_bf.T).astype(jnp.float32),
                        atol=1e-2, rtol=5e-2)

    print("KERNEL_OK")
</pallas_src>

<mosaic_0001>
module attributes {stable_mosaic.version = 11 : i64} {
  func.func @kernel(%arg0: i32, %arg1: memref<16x32xf32, #tpu.memory_space<vmem>>, %arg2: memref<32x4xf32, #tpu.memory_space<vmem>>, %arg3: memref<4x64xf32, #tpu.memory_space<vmem>>, %arg4: memref<1x64xf32, #tpu.memory_space<vmem>>, %arg5: memref<16x64xf32, #tpu.memory_space<vmem>>) attributes {dimension_semantics = [#tpu.dimension_semantics<parallel>], iteration_bounds = array<i64: 1>, scalar_prefetch = 0 : i64, scratch_operands = 0 : i64, tpu.core_type = #tpu.core_type<tc>, window_params = [{transform_indices = @transform_0, window_bounds = array<i64: 16, 32>}, {pipeline_mode = #tpu.pipeline_mode<synchronous>, transform_indices = @transform_1, window_bounds = array<i64: 32, 4>}, {pipeline_mode = #tpu.pipeline_mode<synchronous>, transform_indices = @transform_2, window_bounds = array<i64: 4, 64>}, {pipeline_mode = #tpu.pipeline_mode<synchronous>, transform_indices = @transform_3, window_bounds = array<i64: 1, 64>}, {transform_indices = @transform_4, window_bounds = array<i64: 16, 64>}]} {
    %c0 = arith.constant 0 : index
    %c0_0 = arith.constant 0 : index
    %0 = vector.load %arg1[%c0, %c0_0] : memref<16x32xf32, #tpu.memory_space<vmem>>, vector<16x32xf32>
    %c0_1 = arith.constant 0 : index
    %c0_2 = arith.constant 0 : index
    %1 = vector.load %arg2[%c0_1, %c0_2] : memref<32x4xf32, #tpu.memory_space<vmem>>, vector<32x4xf32>
    %cst = arith.constant dense<0.000000e+00> : vector<16x4xf32>
    %2 = tpu.matmul %0, %1, %cst {dimension_numbers = #tpu.dot_dimension_numbers<[1], [0], [0], [1], [0, 0, 1, 1], [], []>} : vector<16x32xf32>, vector<32x4xf32>, vector<16x4xf32> -> vector<16x4xf32>
    %c0_3 = arith.constant 0 : index
    %c0_4 = arith.constant 0 : index
    %3 = vector.load %arg3[%c0_3, %c0_4] : memref<4x64xf32, #tpu.memory_space<vmem>>, vector<4x64xf32>
    %cst_5 = arith.constant dense<0.000000e+00> : vector<16x64xf32>
    %4 = tpu.matmul %2, %3, %cst_5 {dimension_numbers = #tpu.dot_dimension_numbers<[1], [0], [0], [1], [0, 0, 1, 1], [], []>} : vector<16x4xf32>, vector<4x64xf32>, vector<16x64xf32> -> vector<16x64xf32>
    %c0_6 = arith.constant 0 : index
    %c0_7 = arith.constant 0 : index
    %5 = vector.load %arg4[%c0_6, %c0_7] : memref<1x64xf32, #tpu.memory_space<vmem>>, vector<1x64xf32>
    %6 = vector.broadcast %5 : vector<1x64xf32> to vector<16x64xf32>
    %7 = arith.addf %4, %6 : vector<16x64xf32>
    %c0_8 = arith.constant 0 : index
    %c0_9 = arith.constant 0 : index
    %8 = vector.load %arg5[%c0_8, %c0_9] : memref<16x64xf32, #tpu.memory_space<vmem>>, vector<16x64xf32>
    tpu.vector_store %arg5[%c0_8, %c0_9], %7 {strides = array<i32>} : memref<16x64xf32, #tpu.memory_space<vmem>>, vector<16x64xf32>,
    return
  }
  func.func @transform_0(%arg0: i32) -> (i32, i32) {
    %c0_i32 = arith.constant 0 : i32
    %c0_i32_0 = arith.constant 0 : i32
    return %arg0, %c0_i32 : i32, i32
  }
  func.func @transform_1(%arg0: i32) -> (i32, i32) {
    %c0_i32 = arith.constant 0 : i32
    %c0_i32_0 = arith.constant 0 : i32
    %c0_i32_1 = arith.constant 0 : i32
    return %c0_i32, %c0_i32_0 : i32, i32
  }
  func.func @transform_2(%arg0: i32) -> (i32, i32) {
    %c0_i32 = arith.constant 0 : i32
    %c0_i32_0 = arith.constant 0 : i32
    %c0_i32_1 = arith.constant 0 : i32
    return %c0_i32, %c0_i32_0 : i32, i32
  }
  func.func @transform_3(%arg0: i32) -> (i32, i32) {
    %c0_i32 = arith.constant 0 : i32
    %c0_i32_0 = arith.constant 0 : i32
    %c0_i32_1 = arith.constant 0 : i32
    return %c0_i32, %c0_i32_0 : i32, i32
  }
  func.func @transform_4(%arg0: i32) -> (i32, i32) {
    %c0_i32 = arith.constant 0 : i32
    %c0_i32_0 = arith.constant 0 : i32
    return %arg0, %c0_i32 : i32, i32
  }
}

</mosaic_0001>

<bundles_post_ra>
// kernel: tpu_custom_call.1
= control target key start
LH: loop header
LB: loop body
LE: loop exit
PB: predicated region body
PF: predicated region fallthrough
CT: control target
= control target key end

     0   :  { %s209_s0 = inlined_call_operand.vmem [shape: f32[16,32], index: 0, kind: input, shape index: {}]   ;;  %s210_s1 = inlined_call_operand.vmem [shape: f32[32,4], index: 1, kind: input, shape index: {}]   ;;  %s211_s2 = inlined_call_operand.vmem [shape: f32[4,64], index: 2, kind: input, shape index: {}]   ;;  %s212_s3 = inlined_call_operand.vmem [shape: f32[1,64], index: 3, kind: input, shape index: {}]   ;;  %s213_s4 = inlined_call_operand.hbm [shape: f32[16,64], index: 4, kind: output, shape index: {}]  }
   0x1   :  { %v23_v0 = vld [vmem:[%s210_s1 + $0x18] sm:$0xff]  ;;  %v22_v1 = vld [vmem:[%s210_s1 + $0x10] sm:$0xff]  ;;  %v21_v2 = vld [vmem:[%s210_s1 + $0x8] sm:$0xff] }
   0x2   :  { %119 = vmatpush.msra.mxu2 %v23_v0  ;;  %43 = vmatpush.msra.mxu0 %v23_v0 }
   0x3   :  { %9 = vsyncpa [#allocation3], 0  ;;  %v20_v3 = vld [vmem:[%s210_s1] sm:$0xff]  ;;  %v19_v4 = vld [vmem:[%s209_s0 + $0x8] sm:$0xff]  ;;  %vm24_vm0 = vcmask 261120   ;;  %vm66_vm1 = vcmask 1043456  }
   0x4   :  { %120 = vmatpush.msra.mxu2 %v22_v1  ;;  %44 = vmatpush.msra.mxu0 %v22_v1  ;;  %v18_v5 = vld [vmem:[%s209_s0] sm:$0xff]  ;;  %vm59_vm2 = vcmask 31744   ;;  %vm93_vm3 = vcmask 523264   ;;  %s154_s0 = smov [#allocation2]   ;;  %s102_s6 = sshll.u32 %s213_s4, 4  ;;  %s103_s6 = int_to_ptr.hbm [resolvable:$true] %s102_s6 }
   0x5   :  { %v54_v6 = vld [vmem:[%s211_s2] sm:$0xf]  ;;  %s100_s30 = sshll.u32 %s154_s0, 4  ;;  %s155_s7 = smov 128   ;;  %s101_s30 = int_to_ptr.vmem [resolvable:$true] %s100_s30 }
   0x6   :  { %121 = vmatpush.msra.mxu2 %v21_v2  ;;  %45 = vmatpush.msra.mxu0 %v21_v2  ;;  %v127_v9 = vld [vmem:[%s212_s3] ss:$0 sm:$0xff]  ;;  %s156_s8 = smov 8  }
   0x7   :  { %123 = vmatpush.msk.msra.mxu3 %vm66_vm1, %v54_v6  ;;  %116 = vmatpush.msk.msra.mxu1 %vm66_vm1, %v54_v6 }
   0x8   :  { %122 = vmatpush.msra.mxu2 %v20_v3  ;;  %46 = vmatpush.msra.mxu0 %v20_v3 }
   0x9   :  { %115 = vmatmul.msk.f32.vlgmr.msra.gmra.mxu2 %vm24_vm0, %v19_v4  ;;  %114 = vmatmul.msk.f32.vlgmr.msra.gmra.mxu0 %vm24_vm0, %v18_v5 }
  0x86   :  { %v48_v7 = vpop.f32.mrf.mxu0 }
  0x87   :  { %117 = vmatmul.msk.f32.vlgmr.msra.gmra.mxu1 %vm59_vm2, %v48_v7 }
  0x8c   :  { %v51_v8 = vpop.f32.mrf.mxu2 }
  0x8d   :  { %118 = vmatmul.msk.f32.vlgmr.msra.gmra.mxu3 %vm59_vm2, %v51_v8 }
 0x104   :  { %v87_v10 = vpop.f32.mrf.mxu1 }
 0x105   :  { %v88_v11 = vadd.f32 %v127_v9, %v87_v10 }
 0x107   :  { %94 = vst.msk [vmem:[#allocation2] sm:$0xff] %vm93_vm3, %v88_v11 }
 0x110   :  { %v90_v12 = vpop.f32.mrf.mxu3 }
 0x111   :  { %v91_v13 = vadd.f32 %v127_v9, %v90_v12 }
 0x113   :  { %95 = vst.msk [vmem:[#allocation2 + $0x8] sm:$0xff] %vm93_vm3, %v91_v13 }
 0x114   :  { %108 = dma.vmem_to_hbm [thread:$0]  %s101_s30, 256, %s103_s6, [#allocation3], %s155_s7, %s155_s7, %s156_s8  }
 0x115   :  { %152 = dma.done.wait [#allocation3], 256  }
 0x116   :  { %153 = vsyncadd [#allocation3], 4294967040 }
 0x117   :  { %113 = vsyncpa [#allocation3], 1 }

</bundles_post_ra>
